<compile_context>
chip_gen: v7x
topology: tpu7x:2x2x1
jax: 0.10.0
libtpu: 0.0.40
codegen_flags: <defaults>
</compile_context>

<pallas_src>
import jax
import jax.numpy as jnp
from jax import lax
from jax.experimental import pallas as pl
from jax.experimental.pallas import tpu as pltpu

NEG_SLOPE = 0.01          # nn.LeakyReLU default negative_slope
IN_FEATURES = 13
LAYER_DIMS = [(13, 20), (20, 30), (30, 30), (30, 13), (13, 1)]   # (fan_in, fan_out)
N_LAYERS = len(LAYER_DIMS)
FEAT_PAD = 32             # every feature dim zero-padded to 32 (sublane friendly)


def _leaky_relu(x):
    return jnp.where(x > 0, x, NEG_SLOPE * x)


def heartnet_kernel(x_ref, w_ref, b_ref, o_ref):
    # x_ref: (bt, 13)    batch-major input tile (f32)
    # w_ref: (5, 32, 32) packed weights, PyTorch (out, in) layout, zero padded
    # b_ref: (5, 32, 1)  packed biases, zero padded
    # o_ref: (1, bt)     lane-dense output tile (batch on the lane axis)
    x = x_ref[...]

    # Layer 0 in transposed layout: h = W0[:, :13] @ x^T  -> (32, bt).
    # Padded weight rows / biases are exactly zero, so padded activation rows stay zero.
    w0 = w_ref[0]
    h = lax.dot_general(
        w0[:, :IN_FEATURES], x,
        dimension_numbers=(((1,), (1,)), ((), ())),
        preferred_element_type=jnp.float32,
    ) + b_ref[0]
    h = _leaky_relu(h)

    # Hidden layers 1..3: h = W_i @ h + b_i, LeakyReLU.  Activations stay (32, bt).
    for i in range(1, N_LAYERS - 1):
        h = jnp.dot(w_ref[i], h, preferred_element_type=jnp.float32) + b_ref[i]
        h = _leaky_relu(h)

    # Output layer (no activation); only row 0 of the padded result is real.
    y = jnp.dot(w_ref[N_LAYERS - 1], h,
                preferred_element_type=jnp.float32) + b_ref[N_LAYERS - 1]
    o_ref[...] = y[0:1, :].astype(o_ref.dtype)


def heartnet_forward(x, w_packed, b_packed, *, batch_tile=1024):
    """x: (B, 13) f32.  w_packed: (5,32,32), b_packed: (5,32,1) from pack_params()."""
    B, F = x.shape
    assert F == IN_FEATURES
    assert batch_tile % 128 == 0, "batch_tile must be a multiple of 128 (lane width)"

    # Clamp the tile so tiny batches don't allocate a huge tile, then pad B up to a multiple.
    bt = min(int(batch_tile), ((B + 127) // 128) * 128)
    n_tiles = (B + bt - 1) // bt
    b_pad = n_tiles * bt
    if b_pad != B:
        x = jnp.pad(x, ((0, b_pad - B), (0, 0)))

    out = pl.pallas_call(
        heartnet_kernel,
        out_shape=jax.ShapeDtypeStruct((1, b_pad), jnp.float32),
        grid_spec=pltpu.PrefetchScalarGridSpec(
            num_scalar_prefetch=0,
            grid=(n_tiles,),
            in_specs=[
                pl.BlockSpec((bt, IN_FEATURES), lambda i: (i, 0)),      # x tile
                pl.BlockSpec(w_packed.shape, lambda i: (0, 0, 0)),      # packed weights (resident)
                pl.BlockSpec(b_packed.shape, lambda i: (0, 0, 0)),      # packed biases  (resident)
            ],
            out_specs=pl.BlockSpec((1, bt), lambda i: (0, i)),          # lane-dense output slab
        ),
        compiler_params=pltpu.CompilerParams(
            dimension_semantics=("parallel",)),
    )(x, w_packed, b_packed)

    return out.reshape(b_pad, 1)[:B]


def init_params(key):
    """PyTorch-style nn.Linear init: W (out,in), b (out,), U(-1/sqrt(fan_in), 1/sqrt(fan_in))."""
    layers = []
    for fan_in, fan_out in LAYER_DIMS:
        key, kw, kb = jax.random.split(key, 3)
        bound = 1.0 / jnp.sqrt(jnp.float32(fan_in))
        w = jax.random.uniform(kw, (fan_out, fan_in), jnp.float32, -bound, bound)
        b = jax.random.uniform(kb, (fan_out,), jnp.float32, -bound, bound)
        layers.append((w, b))
    return layers


def pack_params(layers):
    """Pack the 5 (W,b) pairs into zero-padded slabs: (5,32,32) weights, (5,32,1) biases."""
    wp = jnp.zeros((N_LAYERS, FEAT_PAD, FEAT_PAD), jnp.float32)
    bp = jnp.zeros((N_LAYERS, FEAT_PAD, 1), jnp.float32)
    for i, (w, b) in enumerate(layers):
        o, n = w.shape
        wp = wp.at[i, :o, :n].set(w.astype(jnp.float32))
        bp = bp.at[i, :o, 0].set(b.astype(jnp.float32))
    return wp, bp


def reference_forward(x, layers):
    h = x
    for idx, (w, b) in enumerate(layers):
        h = h @ w.T + b
        if idx < N_LAYERS - 1:
            h = jnp.where(h > 0, h, NEG_SLOPE * h)
    return h


if __name__ == "__main__":
    key = jax.random.PRNGKey(0)
    key, kx = jax.random.split(key)

    B = 2000                      # not a tile multiple -> exercises the padding path
    x = jax.random.normal(kx, (B, IN_FEATURES), jnp.float32)

    layers = init_params(key)
    w_packed, b_packed = pack_params(layers)

    out = heartnet_forward(x, w_packed, b_packed, batch_tile=512)   # grid of 4 parallel steps
    out = jax.block_until_ready(out)

    ref = reference_forward(x, layers)
    assert out.shape == (B, 1)
    assert jnp.allclose(out, ref, atol=1e-4, rtol=1e-4), "mismatch vs JAX reference"

    print("KERNEL_OK")
</pallas_src>

<mosaic_0001>
module attributes {stable_mosaic.version = 11 : i64} {
  func.func @heartnet_kernel(%arg0: i32, %arg1: memref<512x13xf32, #tpu.memory_space<vmem>>, %arg2: memref<5x32x32xf32, #tpu.memory_space<vmem>>, %arg3: memref<5x32x1xf32, #tpu.memory_space<vmem>>, %arg4: memref<1x512xf32, #tpu.memory_space<vmem>>) attributes {dimension_semantics = [#tpu.dimension_semantics<parallel>], iteration_bounds = array<i64: 4>, scalar_prefetch = 0 : i64, scratch_operands = 0 : i64, tpu.core_type = #tpu.core_type<tc>, window_params = [{transform_indices = @transform_0, window_bounds = array<i64: 512, 13>}, {pipeline_mode = #tpu.pipeline_mode<synchronous>, transform_indices = @transform_1, window_bounds = array<i64: 5, 32, 32>}, {pipeline_mode = #tpu.pipeline_mode<synchronous>, transform_indices = @transform_2, window_bounds = array<i64: 5, 32, 1>}, {transform_indices = @transform_3, window_bounds = array<i64: 1, 512>}]} {
    %c0 = arith.constant 0 : index
    %c0_0 = arith.constant 0 : index
    %0 = vector.load %arg1[%c0, %c0_0] : memref<512x13xf32, #tpu.memory_space<vmem>>, vector<512x13xf32>
    %c0_1 = arith.constant 0 : index
    %c0_2 = arith.constant 0 : index
    %c0_3 = arith.constant 0 : index
    %1 = vector.load %arg2[%c0_1, %c0_2, %c0_3] : memref<5x32x32xf32, #tpu.memory_space<vmem>>, vector<1x32x32xf32>
    %2 = vector.shape_cast %1 : vector<1x32x32xf32> to vector<32x32xf32>
    %3 = vector.extract_strided_slice %2 {offsets = [0, 0], sizes = [32, 13], strides = [1, 1]} : vector<32x32xf32> to vector<32x13xf32>
    %cst = arith.constant dense<0.000000e+00> : vector<32x512xf32>
    %4 = tpu.matmul %3, %0, %cst {dimension_numbers = #tpu.dot_dimension_numbers<[1], [1], [0], [0], [0, 0, 1, 0], [], []>} : vector<32x13xf32>, vector<512x13xf32>, vector<32x512xf32> -> vector<32x512xf32>
    %c0_4 = arith.constant 0 : index
    %c0_5 = arith.constant 0 : index
    %c0_6 = arith.constant 0 : index
    %5 = vector.load %arg3[%c0_4, %c0_5, %c0_6] : memref<5x32x1xf32, #tpu.memory_space<vmem>>, vector<1x32x1xf32>
    %6 = vector.shape_cast %5 : vector<1x32x1xf32> to vector<32x1xf32>
    %7 = vector.broadcast %6 : vector<32x1xf32> to vector<32x512xf32>
    %8 = arith.addf %4, %7 : vector<32x512xf32>
    %cst_7 = arith.constant 0.000000e+00 : f32
    %9 = vector.broadcast %cst_7 : f32 to vector<32x512xf32>
    %10 = arith.cmpf ogt, %8, %9 : vector<32x512xf32>
    %cst_8 = arith.constant 0.00999999977 : f32
    %11 = vector.broadcast %cst_8 : f32 to vector<32x512xf32>
    %12 = arith.mulf %11, %8 : vector<32x512xf32>
    %13 = arith.select %10, %8, %12 : vector<32x512xi1>, vector<32x512xf32>
    %c1 = arith.constant 1 : index
    %c0_9 = arith.constant 0 : index
    %c0_10 = arith.constant 0 : index
    %14 = vector.load %arg2[%c1, %c0_9, %c0_10] : memref<5x32x32xf32, #tpu.memory_space<vmem>>, vector<1x32x32xf32>
    %15 = vector.shape_cast %14 : vector<1x32x32xf32> to vector<32x32xf32>
    %cst_11 = arith.constant dense<0.000000e+00> : vector<32x512xf32>
    %16 = tpu.matmul %15, %13, %cst_11 {dimension_numbers = #tpu.dot_dimension_numbers<[1], [0], [0], [1], [0, 0, 1, 1], [], []>} : vector<32x32xf32>, vector<32x512xf32>, vector<32x512xf32> -> vector<32x512xf32>
    %c1_12 = arith.constant 1 : index
    %c0_13 = arith.constant 0 : index
    %c0_14 = arith.constant 0 : index
    %17 = vector.load %arg3[%c1_12, %c0_13, %c0_14] : memref<5x32x1xf32, #tpu.memory_space<vmem>>, vector<1x32x1xf32>
    %18 = vector.shape_cast %17 : vector<1x32x1xf32> to vector<32x1xf32>
    %19 = vector.broadcast %18 : vector<32x1xf32> to vector<32x512xf32>
    %20 = arith.addf %16, %19 : vector<32x512xf32>
    %cst_15 = arith.constant 0.000000e+00 : f32
    %21 = vector.broadcast %cst_15 : f32 to vector<32x512xf32>
    %22 = arith.cmpf ogt, %20, %21 : vector<32x512xf32>
    %cst_16 = arith.constant 0.00999999977 : f32
    %23 = vector.broadcast %cst_16 : f32 to vector<32x512xf32>
    %24 = arith.mulf %23, %20 : vector<32x512xf32>
    %25 = arith.select %22, %20, %24 : vector<32x512xi1>, vector<32x512xf32>
    %c2 = arith.constant 2 : index
    %c0_17 = arith.constant 0 : index
    %c0_18 = arith.constant 0 : index
    %26 = vector.load %arg2[%c2, %c0_17, %c0_18] : memref<5x32x32xf32, #tpu.memory_space<vmem>>, vector<1x32x32xf32>
    %27 = vector.shape_cast %26 : vector<1x32x32xf32> to vector<32x32xf32>
    %cst_19 = arith.constant dense<0.000000e+00> : vector<32x512xf32>
    %28 = tpu.matmul %27, %25, %cst_19 {dimension_numbers = #tpu.dot_dimension_numbers<[1], [0], [0], [1], [0, 0, 1, 1], [], []>} : vector<32x32xf32>, vector<32x512xf32>, vector<32x512xf32> -> vector<32x512xf32>
    %c2_20 = arith.constant 2 : index
    %c0_21 = arith.constant 0 : index
    %c0_22 = arith.constant 0 : index
    %29 = vector.load %arg3[%c2_20, %c0_21, %c0_22] : memref<5x32x1xf32, #tpu.memory_space<vmem>>, vector<1x32x1xf32>
    %30 = vector.shape_cast %29 : vector<1x32x1xf32> to vector<32x1xf32>
    %31 = vector.broadcast %30 : vector<32x1xf32> to vector<32x512xf32>
    %32 = arith.addf %28, %31 : vector<32x512xf32>
    %cst_23 = arith.constant 0.000000e+00 : f32
    %33 = vector.broadcast %cst_23 : f32 to vector<32x512xf32>
    %34 = arith.cmpf ogt, %32, %33 : vector<32x512xf32>
    %cst_24 = arith.constant 0.00999999977 : f32
    %35 = vector.broadcast %cst_24 : f32 to vector<32x512xf32>
    %36 = arith.mulf %35, %32 : vector<32x512xf32>
    %37 = arith.select %34, %32, %36 : vector<32x512xi1>, vector<32x512xf32>
    %c3 = arith.constant 3 : index
    %c0_25 = arith.constant 0 : index
    %c0_26 = arith.constant 0 : index
    %38 = vector.load %arg2[%c3, %c0_25, %c0_26] : memref<5x32x32xf32, #tpu.memory_space<vmem>>, vector<1x32x32xf32>
    %39 = vector.shape_cast %38 : vector<1x32x32xf32> to vector<32x32xf32>
    %cst_27 = arith.constant dense<0.000000e+00> : vector<32x512xf32>
    %40 = tpu.matmul %39, %37, %cst_27 {dimension_numbers = #tpu.dot_dimension_numbers<[1], [0], [0], [1], [0, 0, 1, 1], [], []>} : vector<32x32xf32>, vector<32x512xf32>, vector<32x512xf32> -> vector<32x512xf32>
    %c3_28 = arith.constant 3 : index
    %c0_29 = arith.constant 0 : index
    %c0_30 = arith.constant 0 : index
    %41 = vector.load %arg3[%c3_28, %c0_29, %c0_30] : memref<5x32x1xf32, #tpu.memory_space<vmem>>, vector<1x32x1xf32>
    %42 = vector.shape_cast %41 : vector<1x32x1xf32> to vector<32x1xf32>
    %43 = vector.broadcast %42 : vector<32x1xf32> to vector<32x512xf32>
    %44 = arith.addf %40, %43 : vector<32x512xf32>
    %cst_31 = arith.constant 0.000000e+00 : f32
    %45 = vector.broadcast %cst_31 : f32 to vector<32x512xf32>
    %46 = arith.cmpf ogt, %44, %45 : vector<32x512xf32>
    %cst_32 = arith.constant 0.00999999977 : f32
    %47 = vector.broadcast %cst_32 : f32 to vector<32x512xf32>
    %48 = arith.mulf %47, %44 : vector<32x512xf32>
    %49 = arith.select %46, %44, %48 : vector<32x512xi1>, vector<32x512xf32>
    %c4 = arith.constant 4 : index
    %c0_33 = arith.constant 0 : index
    %c0_34 = arith.constant 0 : index
    %50 = vector.load %arg2[%c4, %c0_33, %c0_34] : memref<5x32x32xf32, #tpu.memory_space<vmem>>, vector<1x32x32xf32>
    %51 = vector.shape_cast %50 : vector<1x32x32xf32> to vector<32x32xf32>
    %cst_35 = arith.constant dense<0.000000e+00> : vector<32x512xf32>
    %52 = tpu.matmul %51, %49, %cst_35 {dimension_numbers = #tpu.dot_dimension_numbers<[1], [0], [0], [1], [0, 0, 1, 1], [], []>} : vector<32x32xf32>, vector<32x512xf32>, vector<32x512xf32> -> vector<32x512xf32>
    %c4_36 = arith.constant 4 : index
    %c0_37 = arith.constant 0 : index
    %c0_38 = arith.constant 0 : index
    %53 = vector.load %arg3[%c4_36, %c0_37, %c0_38] : memref<5x32x1xf32, #tpu.memory_space<vmem>>, vector<1x32x1xf32>
    %54 = vector.shape_cast %53 : vector<1x32x1xf32> to vector<32x1xf32>
    %55 = vector.broadcast %54 : vector<32x1xf32> to vector<32x512xf32>
    %56 = arith.addf %52, %55 : vector<32x512xf32>
    %57 = vector.extract_strided_slice %56 {offsets = [0, 0], sizes = [1, 512], strides = [1, 1]} : vector<32x512xf32> to vector<1x512xf32>
    %c0_39 = arith.constant 0 : index
    %c0_40 = arith.constant 0 : index
    %58 = vector.load %arg4[%c0_39, %c0_40] : memref<1x512xf32, #tpu.memory_space<vmem>>, vector<1x512xf32>
    tpu.vector_store %arg4[%c0_39, %c0_40], %57 {strides = array<i32>} : memref<1x512xf32, #tpu.memory_space<vmem>>, vector<1x512xf32>,
    return
  }
  func.func @transform_0(%arg0: i32) -> (i32, i32) {
    %c0_i32 = arith.constant 0 : i32
    %c0_i32_0 = arith.constant 0 : i32
    return %arg0, %c0_i32 : i32, i32
  }
  func.func @transform_1(%arg0: i32) -> (i32, i32, i32) {
    %c0_i32 = arith.constant 0 : i32
    %c0_i32_0 = arith.constant 0 : i32
    %c0_i32_1 = arith.constant 0 : i32
    %c0_i32_2 = arith.constant 0 : i32
    return %c0_i32, %c0_i32_0, %c0_i32_1 : i32, i32, i32
  }
  func.func @transform_2(%arg0: i32) -> (i32, i32, i32) {
    %c0_i32 = arith.constant 0 : i32
    %c0_i32_0 = arith.constant 0 : i32
    %c0_i32_1 = arith.constant 0 : i32
    %c0_i32_2 = arith.constant 0 : i32
    return %c0_i32, %c0_i32_0, %c0_i32_1 : i32, i32, i32
  }
  func.func @transform_3(%arg0: i32) -> (i32, i32) {
    %c0_i32 = arith.constant 0 : i32
    %c0_i32_0 = arith.constant 0 : i32
    return %c0_i32, %arg0 : i32, i32
  }
}

</mosaic_0001>

<bundles_post_ra>
// kernel: tpu_custom_call.1
= control target key start
LH: loop header
LB: loop body
LE: loop exit
PB: predicated region body
PF: predicated region fallthrough
CT: control target
= control target key end

     0   :  { %8 = vsyncpa [#allocation3], 0  ;;  %s2802_s0 = inlined_call_operand.vmem [shape: f32[2048,13], index: 0, kind: input, shape index: {}]   ;;  %s2803_s1 = inlined_call_operand.vmem [shape: f32[5,32,32], index: 1, kind: input, shape index: {}]   ;;  %s2804_s2 = inlined_call_operand.vmem [shape: f32[5,32,1], index: 2, kind: input, shape index: {}]   ;;  %s2805_s3 = inlined_call_operand.hbm [shape: f32[1,2048], index: 3, kind: output, shape index: {}]  }
   0x1   :  { %10 = vsyncpa [#allocation3 + $0x1], 0  ;;  %s2334_s12 = smov 0   ;;  %s2336_s13 = smov 0  }
   0x2   :  { %s2338_s14 = smov 0   ;;  %s2340_s15 = smov 0  }
   0x3 LB: > { %s1812_s16 = sadd.s32 4294967295, %s2308_s15   ;;  %s1813_s17 = sadd.s32 4294967294, %s2308_s15   ;;  %s2308_s15 = sphi %s2340_s15, %s2813_s15   ;;  %s2304_s14 = sphi %s2338_s14, %s2812_s14   ;;  %s2300_s13 = sphi %s2336_s13, %s2811_s13   ;;  %s2296_s12 = sphi %s2334_s12, %s2810_s12  }
   0x4   : > { %s2357_s18 = sadd.s32 1, %s2308_s15   ;;  %s91_s19 = sadd.s32 1, %s2304_s14 }
   0x5   : > { %s88_s20 = ssub.s32 %s2308_s15, %s2357_s18  ;;  %p101_p0 = scmp.ne.s32.totalorder %s2304_s14, %s2300_s13 }
   0x6   : > { %p89_p1 = scmp.eq.s32.totalorder %s88_s20, 0  ;;  %p102_p2 = scmp.eq.s32.totalorder %s1812_s16, 3 }
   0x7   : > { %p107_p3 = scmp.ne.s32.totalorder %s2300_s13, %s2296_s12  ;;  %p108_p4 = scmp.eq.s32.totalorder %s1813_s17, 3 }
   0x8   : > { %s2367_s21 = scalar_select %p89_p1, %s2304_s14, %s91_s19  }
   0x9   : > { %p2369_p5 = por %p102_p2, %p101_p0  ;;  %p2373_p6 = por %p108_p4, %p107_p3 }
   0xa   : > { %p1816_p7 = scmp.ge.s32.totalorder %s2308_s15, 1  ;;  %p141_p8 = scmp.lt.s32.totalorder %s2308_s15, 5 }
   0xc   : > { %p142_p9 = pnand %p1816_p7, %p141_p8 }
   0xd   : > { %s2379_s24 = sshll.u32 (!%p142_p9), %s1812_s16, 6  ;;  %vm264_vm0 = vcmask (!%p142_p9), 105472   ;;  %v2384_v0 = vld [vmem:[%s2803_s1] sm:$0xff] (!%p142_p9)  ;;  %v2310_v2 = vmov (!%p142_p9), 0   ;;  %v242_v3 = vld [vmem:[%s2804_s2 + $0x10] sm:$0xff] (!%p142_p9)  ;;  %v241_v4 = vld [vmem:[%s2804_s2 + $0x8] sm:$0xff] (!%p142_p9) }
   0xe   : > { %145 = sbr.rel (%p142_p9) target bundleno = 1280 (0x500), region = 32  ;;  %p166_p10 = scmp.lt.s32.totalorder (!%p142_p9), %s2379_s24, 255  ;;  %1994 = vmatprep.mubr.msk.f32.mxu0 (!%p142_p9), %vm264_vm0, %v2384_v0  ;;  %2034 = vmatprep.mubr.msk.f32.mxu1 (!%p142_p9), %vm264_vm0, %v2384_v0  ;;  %v240_v1 = vld [vmem:[%s2804_s2] sm:$0xff] (!%p142_p9)  ;;  %v243_v5 = vld [vmem:[%s2804_s2 + $0x18] sm:$0xff] (!%p142_p9)  ;;  %vm2411_vm1 = vmpackc.low (!%p142_p9), %vm264_vm0, %vm264_vm0  ;;  %v2311_v6 = vmov (!%p142_p9), 0.0  }
   0xf   : > { %2244 = vset.pattern.permute.xlu0 (!%p142_p9), %v2310_v2  ;;  %2245 = vset.pattern.permute.xlu1 (!%p142_p9), %v2310_v2  ;;  %v1896_v10 = vld [vmem:[%s2804_s2 + $0x20] sm:$0xff] (!%p142_p9)  ;;  %v1898_v26 = vld [vmem:[%s2804_s2 + $0x30] sm:$0xff] (!%p142_p9)  ;;  %v1897_v27 = vld [vmem:[%s2804_s2 + $0x28] sm:$0xff] (!%p142_p9)  ;;  %s2758_s11 = scalar_lea.hbm (!%p142_p9), %s2805_s3, %s2379_s24  ;;  %s2313_s20 = smov (!%p142_p9), [#allocation2]  }
  0x10   : > { %246 = vperm.xlu0 (!%p142_p9), %2244, %v240_v1   ;;  %256 = vperm.xlu1 (!%p142_p9), %2245, %v242_v3   ;;  %v1899_v37 = vld [vmem:[%s2804_s2 + $0x38] sm:$0xff] (!%p142_p9)  ;;  %v1912_v41 = vld [vmem:[%s2804_s2 + $0x40] sm:$0xff] (!%p142_p9)  ;;  %v1913_v42 = vld [vmem:[%s2804_s2 + $0x48] sm:$0xff] (!%p142_p9) }
  0x11   : > { %v1914_v51 = vld [vmem:[%s2804_s2 + $0x50] sm:$0xff] (!%p142_p9)  ;;  %v1915_v53 = vld [vmem:[%s2804_s2 + $0x58] sm:$0xff] (!%p142_p9)  ;;  %v1928_v57 = vld [vmem:[%s2804_s2 + $0x60] sm:$0xff] (!%p142_p9) }
  0x12   : > { %v1929_v58 = vld [vmem:[%s2804_s2 + $0x68] sm:$0xff] (!%p142_p9) }
  0x14   : > { %251 = vperm.xlu0 (!%p142_p9), %2244, %v241_v4   ;;  %261 = vperm.xlu1 (!%p142_p9), %2245, %v243_v5   ;;  %v1930_v4 = vld [vmem:[%s2804_s2 + $0x70] sm:$0xff] (!%p142_p9) }
  0x15   : > { %s167_s4 = scalar_select %p166_p10, %s2379_s24, 255 }
  0x16   : > { %s2250_s24 = sshll.u32 %s2313_s20, 4  ;;  %s2251_s24 = int_to_ptr.vmem [resolvable:$false] %s2250_s24 }
  0x17   : > { %s1819_s9 = sshll.u32 %s167_s4, 3  ;;  %s2252_s25 = scalar_lea.vmem %s2251_s24, 128 }
  0x18   : > { %s2407_s16 = scalar_lea.vmem %s2802_s0, %s1819_s9  ;;  %707 = vperm.xlu0 %2244, %v1896_v10   ;;  %712 = vperm.xlu1 %2245, %v1897_v27  }
  0x19   : > { %v188_v7 = vld [vmem:[%s2407_s16 + $0x80] sm:$0xff]  ;;  %v189_v8 = vld [vmem:[%s2407_s16 + $0x88] sm:$0xff]  ;;  %v190_v19 = vld [vmem:[%s2407_s16 + $0x90] sm:$0xff] }
  0x1a   : > { %v220_v9 = vld [vmem:[%s2407_s16 + $0x180] sm:$0xff]  ;;  %v2042_v11 = vpack.c.bf16 %v189_v8, %v188_v7  ;;  %v221_v12 = vld [vmem:[%s2407_s16 + $0x188] sm:$0xff]  ;;  %v191_v21 = vld [vmem:[%s2407_s16 + $0x98] sm:$0xff] }
  0x1b   : > { %v172_v13 = vld [vmem:[%s2407_s16] sm:$0xff]  ;;  %v173_v14 = vld [vmem:[%s2407_s16 + $0x8] sm:$0xff]  ;;  %v2090_v15 = vpack.c.bf16 %v221_v12, %v220_v9  ;;  %v222_v22 = vld [vmem:[%s2407_s16 + $0x190] sm:$0xff]  ;;  %v2048_v24 = vpack.c.bf16 %v191_v21, %v190_v19 }
  0x1c   : > { %v2045_v16 = vpack.c.bf16 %v173_v14, %v172_v13  ;;  %v204_v17 = vld [vmem:[%s2407_s16 + $0x100] sm:$0xff]  ;;  %v205_v18 = vld [vmem:[%s2407_s16 + $0x108] sm:$0xff]  ;;  %2044 = vmatprep.subr.msk.bf16.mxu0 %vm2411_vm1, %v2042_v11  ;;  %v223_v23 = vld [vmem:[%s2407_s16 + $0x198] sm:$0xff]  ;;  %717 = vperm.xlu0 %2244, %v1898_v26  }
  0x1d   : > { %v2093_v20 = vpack.c.bf16 %v205_v18, %v204_v17  ;;  %2092 = vmatprep.subr.msk.bf16.mxu1 %vm2411_vm1, %v2090_v15  ;;  %v2096_v25 = vpack.c.bf16 %v223_v23, %v222_v22  ;;  %v174_v28 = vld [vmem:[%s2407_s16 + $0x10] sm:$0xff]  ;;  %v175_v29 = vld [vmem:[%s2407_s16 + $0x18] sm:$0xff]  ;;  %v192_v32 = vld [vmem:[%s2407_s16 + $0xa0] sm:$0xff]  ;;  %722 = vperm.xlu1 %2245, %v1899_v37  }
  0x1e   : > { %2047 = vmatpush3.bf16.xpose.msk.msra.mxu0 %vm2411_vm1, %v2045_v16  ;;  %v206_v30 = vld [vmem:[%s2407_s16 + $0x110] sm:$0xff]  ;;  %v207_v31 = vld [vmem:[%s2407_s16 + $0x118] sm:$0xff]  ;;  %v193_v33 = vld [vmem:[%s2407_s16 + $0xa8] sm:$0xff]  ;;  %v2051_v36 = vpack.c.bf16 %v175_v29, %v174_v28 }
  0x1f   : > { %2095 = vmatpush3.bf16.xpose.msk.msra.mxu1 %vm2411_vm1, %v2093_v20  ;;  %2050 = vmatprep.subr.msk.bf16.mxu0 %vm2411_vm1, %v2048_v24  ;;  %v224_v34 = vld [vmem:[%s2407_s16 + $0x1a0] sm:$0xff]  ;;  %v225_v35 = vld [vmem:[%s2407_s16 + $0x1a8] sm:$0xff]  ;;  %v2099_v38 = vpack.c.bf16 %v207_v31, %v206_v30  ;;  %v2054_v39 = vpack.c.bf16 %v193_v33, %v192_v32  ;;  %v194_v47 = vld [vmem:[%s2407_s16 + $0xb0] sm:$0xff] }
  0x20   : > { %2098 = vmatprep.subr.msk.bf16.mxu1 %vm2411_vm1, %v2096_v25  ;;  %v2102_v40 = vpack.c.bf16 %v225_v35, %v224_v34  ;;  %v176_v43 = vld [vmem:[%s2407_s16 + $0x20] sm:$0xff]  ;;  %v177_v44 = vld [vmem:[%s2407_s16 + $0x28] sm:$0xff]  ;;  %v195_v48 = vld [vmem:[%s2407_s16 + $0xb8] sm:$0xff]  ;;  %976 = vperm.xlu0 %2244, %v1912_v41  }
  0x21   : > { %v208_v45 = vld [vmem:[%s2407_s16 + $0x120] sm:$0xff]  ;;  %v209_v46 = vld [vmem:[%s2407_s16 + $0x128] sm:$0xff]  ;;  %v226_v49 = vld [vmem:[%s2407_s16 + $0x1b0] sm:$0xff]  ;;  %981 = vperm.xlu1 %2245, %v1913_v42   ;;  %v2057_v52 = vpack.c.bf16 %v177_v44, %v176_v43  ;;  %v2060_v55 = vpack.c.bf16 %v195_v48, %v194_v47 }
  0x22   : > { %v227_v50 = vld [vmem:[%s2407_s16 + $0x1b8] sm:$0xff]  ;;  %v2105_v54 = vpack.c.bf16 %v209_v46, %v208_v45  ;;  %v178_v59 = vld [vmem:[%s2407_s16 + $0x30] sm:$0xff]  ;;  %v196_v63 = vld [vmem:[%s2407_s16 + $0xc0] sm:$0xff] }
  0x23   : > { %v2108_v56 = vpack.c.bf16 %v227_v50, %v226_v49  ;;  %v179_v60 = vld [vmem:[%s2407_s16 + $0x38] sm:$0xff]  ;;  %v210_v61 = vld [vmem:[%s2407_s16 + $0x130] sm:$0xff]  ;;  %v197_v1 = vld [vmem:[%s2407_s16 + $0xc8] sm:$0xff] }
  0x24   : > { %986 = vperm.xlu0 %2244, %v1914_v51   ;;  %v211_v62 = vld [vmem:[%s2407_s16 + $0x138] sm:$0xff]  ;;  %v228_v2 = vld [vmem:[%s2407_s16 + $0x1c0] sm:$0xff]  ;;  %v229_v3 = vld [vmem:[%s2407_s16 + $0x1c8] sm:$0xff]  ;;  %v2063_v5 = vpack.c.bf16 %v179_v60, %v178_v59  ;;  %v2066_v9 = vpack.c.bf16 %v197_v1, %v196_v63 }
  0x25   : > { %991 = vperm.xlu1 %2245, %v1915_v53   ;;  %v1931_v7 = vld [vmem:[%s2804_s2 + $0x78] sm:$0xff]  ;;  %v2111_v8 = vpack.c.bf16 %v211_v62, %v210_v61  ;;  %v2114_v10 = vpack.c.bf16 %v229_v3, %v228_v2  ;;  %v1944_v11 = vld [vmem:[%s2804_s2 + $0x80] sm:$0xff]  ;;  %v181_v13 = vld [vmem:[%s2407_s16 + $0x48] sm:$0xff] }
  0x26   : > { %2053 = vmatpush3.bf16.xpose.msk.msra.mxu0 %vm2411_vm1, %v2051_v36  ;;  %v180_v12 = vld [vmem:[%s2407_s16 + $0x40] sm:$0xff]  ;;  %v213_v15 = vld [vmem:[%s2407_s16 + $0x148] sm:$0xff]  ;;  %v198_v16 = vld [vmem:[%s2407_s16 + $0xd0] sm:$0xff] }
  0x27   : > { %2101 = vmatpush3.bf16.xpose.msk.msra.mxu1 %vm2411_vm1, %v2099_v38  ;;  %2056 = vmatprep.subr.msk.bf16.mxu0 %vm2411_vm1, %v2054_v39  ;;  %v212_v14 = vld [vmem:[%s2407_s16 + $0x140] sm:$0xff]  ;;  %v199_v17 = vld [vmem:[%s2407_s16 + $0xd8] sm:$0xff]  ;;  %v230_v18 = vld [vmem:[%s2407_s16 + $0x1d0] sm:$0xff]  ;;  %v2069_v20 = vpack.c.bf16 %v181_v13, %v180_v12 }
  0x28   : > { %2104 = vmatprep.subr.msk.bf16.mxu1 %vm2411_vm1, %v2102_v40  ;;  %1244 = vperm.xlu0 %2244, %v1928_v57   ;;  %v231_v19 = vld [vmem:[%s2407_s16 + $0x1d8] sm:$0xff]  ;;  %v2117_v21 = vpack.c.bf16 %v213_v15, %v212_v14  ;;  %v2072_v22 = vpack.c.bf16 %v199_v17, %v198_v16  ;;  %v182_v24 = vld [vmem:[%s2407_s16 + $0x50] sm:$0xff]  ;;  %v200_v28 = vld [vmem:[%s2407_s16 + $0xe0] sm:$0xff] }
  0x29   : > { %1249 = vperm.xlu1 %2245, %v1929_v58   ;;  %v2120_v23 = vpack.c.bf16 %v231_v19, %v230_v18  ;;  %v183_v25 = vld [vmem:[%s2407_s16 + $0x58] sm:$0xff]  ;;  %v214_v26 = vld [vmem:[%s2407_s16 + $0x150] sm:$0xff]  ;;  %v201_v29 = vld [vmem:[%s2407_s16 + $0xe8] sm:$0xff] }
  0x2a   : > { %v215_v27 = vld [vmem:[%s2407_s16 + $0x158] sm:$0xff]  ;;  %v232_v30 = vld [vmem:[%s2407_s16 + $0x1e0] sm:$0xff]  ;;  %v233_v31 = vld [vmem:[%s2407_s16 + $0x1e8] sm:$0xff]  ;;  %v2075_v32 = vpack.c.bf16 %v183_v25, %v182_v24  ;;  %v2078_v34 = vpack.c.bf16 %v201_v29, %v200_v28 }
  0x2b   : > { %v2123_v33 = vpack.c.bf16 %v215_v27, %v214_v26  ;;  %v2126_v35 = vpack.c.bf16 %v233_v31, %v232_v30  ;;  %v184_v36 = vld [vmem:[%s2407_s16 + $0x60] sm:$0xff]  ;;  %v185_v37 = vld [vmem:[%s2407_s16 + $0x68] sm:$0xff]  ;;  %v202_v40 = vld [vmem:[%s2407_s16 + $0xf0] sm:$0xff] }
  0x2c   : > { %1254 = vperm.xlu0 %2244, %v1930_v4   ;;  %v216_v38 = vld [vmem:[%s2407_s16 + $0x160] sm:$0xff]  ;;  %v217_v39 = vld [vmem:[%s2407_s16 + $0x168] sm:$0xff]  ;;  %v203_v41 = vld [vmem:[%s2407_s16 + $0xf8] sm:$0xff]  ;;  %v2081_v44 = vpack.c.bf16 %v185_v37, %v184_v36 }
  0x2d   : > { %1259 = vperm.xlu1 %2245, %v1931_v7   ;;  %v234_v42 = vld [vmem:[%s2407_s16 + $0x1f0] sm:$0xff]  ;;  %v235_v43 = vld [vmem:[%s2407_s16 + $0x1f8] sm:$0xff]  ;;  %v2129_v45 = vpack.c.bf16 %v217_v39, %v216_v38  ;;  %v2084_v46 = vpack.c.bf16 %v203_v41, %v202_v40 }
  0x2e   : > { %2059 = vmatpush3.bf16.xpose.msk.msra.mxu0 %vm2411_vm1, %v2057_v52  ;;  %v2132_v47 = vpack.c.bf16 %v235_v43, %v234_v42  ;;  %v186_v48 = vld [vmem:[%s2407_s16 + $0x70] sm:$0xff]  ;;  %v187_v49 = vld [vmem:[%s2407_s16 + $0x78] sm:$0xff] }
  0x2f   : > { %2107 = vmatpush3.bf16.xpose.msk.msra.mxu1 %vm2411_vm1, %v2105_v54  ;;  %2062 = vmatprep.subr.msk.bf16.mxu0 %vm2411_vm1, %v2060_v55  ;;  %v218_v50 = vld [vmem:[%s2407_s16 + $0x170] sm:$0xff]  ;;  %v219_v51 = vld [vmem:[%s2407_s16 + $0x178] sm:$0xff]  ;;  %v2087_v52 = vpack.c.bf16 %v187_v49, %v186_v48  ;;  %v237_v54 = vld [vmem:[%s2803_s1 + $0x8] sm:$0xff]  ;;  %s162_s16 = sand.u32 1, %s2300_s13  }
  0x30   : > { %2110 = vmatprep.subr.msk.bf16.mxu1 %vm2411_vm1, %v2108_v56  ;;  %1512 = vperm.xlu0 %2244, %v1944_v11   ;;  %v2135_v53 = vpack.c.bf16 %v219_v51, %v218_v50  ;;  %v238_v55 = vld [vmem:[%s2803_s1 + $0x10] sm:$0xff]  ;;  %s1817_s6 = sshll.u32 %s162_s16, 2  ;;  %s1740_s17 = scalar_lea.sflag [#allocation3], %s162_s16 }
  0x31   : > { %s164_s7 = scalar_lea.vmem [#allocation2], %s1817_s6 }
  0x32   : > { %s1754_s8 = sshll.u32 %s164_s7, 4  ;;  %s2760_s8 = int_to_ptr.vmem [resolvable:$true] %s1754_s8 }
  0x33   : > { %s2246_s19 = scalar_lea.vmem %s2760_s8, 64  ;;  %p2253_p0 = scmp.lt.s32.totalorder %s2760_s8, %s2251_s24 }
  0x34   : > { %p2247_p11 = scmp.ne.s32.totalorder %s2760_s8, %s2246_s19  ;;  %p2254_p1 = scmp.lt.s32.totalorder %s2252_s25, %s2246_s19 }
  0x36   : > { %2065 = vmatpush3.bf16.xpose.msk.msra.mxu0 %vm2411_vm1, %v2063_v5  ;;  %p2248_p12 = pnand %p2247_p11, %p2369_p5  ;;  %p2255_p2 = por %p2254_p1, %p2253_p0 }
  0x37   : > { %2113 = vmatpush3.bf16.xpose.msk.msra.mxu1 %vm2411_vm1, %v2111_v8  ;;  %2068 = vmatprep.subr.msk.bf16.mxu0 %vm2411_vm1, %v2066_v9 }
  0x38   : > { %2116 = vmatprep.subr.msk.bf16.mxu1 %vm2411_vm1, %v2114_v10  ;;  %p2249_p13 = pneg %p2248_p12 }
  0x3a   : > { %p2256_p3 = pnand %p2255_p2, %p2249_p13 }
  0x3e   : > { %2071 = vmatpush3.bf16.xpose.msk.msra.mxu0 %vm2411_vm1, %v2069_v20 }
  0x3f   : > { %2119 = vmatpush3.bf16.xpose.msk.msra.mxu1 %vm2411_vm1, %v2117_v21  ;;  %2074 = vmatprep.subr.msk.bf16.mxu0 %vm2411_vm1, %v2072_v22 }
  0x40   : > { %2122 = vmatprep.subr.msk.bf16.mxu1 %vm2411_vm1, %v2120_v23 }
  0x46   : > { %2077 = vmatpush3.bf16.xpose.msk.msra.mxu0 %vm2411_vm1, %v2075_v32 }
  0x47   : > { %2125 = vmatpush3.bf16.xpose.msk.msra.mxu1 %vm2411_vm1, %v2123_v33  ;;  %2080 = vmatprep.subr.msk.bf16.mxu0 %vm2411_vm1, %v2078_v34 }
  0x48   : > { %2128 = vmatprep.subr.msk.bf16.mxu1 %vm2411_vm1, %v2126_v35 }
  0x4e   : > { %2083 = vmatpush3.bf16.xpose.msk.msra.mxu0 %vm2411_vm1, %v2081_v44 }
  0x4f   : > { %2131 = vmatpush3.bf16.xpose.msk.msra.mxu1 %vm2411_vm1, %v2129_v45  ;;  %2086 = vmatprep.subr.msk.bf16.mxu0 %vm2411_vm1, %v2084_v46 }
  0x50   : > { %2134 = vmatprep.subr.msk.bf16.mxu1 %vm2411_vm1, %v2132_v47 }
  0x56   : > { %2089 = vmatpush3.bf16.xpose.msk.msra.mxu0 %vm2411_vm1, %v2087_v52 }
  0x57   : > { %2137 = vmatpush3.bf16.xpose.msk.msra.mxu1 %vm2411_vm1, %v2135_v53 }
  0x5d   : > { %1995 = vmatmul.mubr.msk.f32.vlgmr.msra.gmra.mrb[0].mxu0 %vm264_vm0, %v2384_v0 }
  0x5e   : > { %2035 = vmatmul.mubr.msk.f32.vlgmr.msra.gmra.mrb[0].mxu1 %vm264_vm0, %v2384_v0  ;;  %1996 = vmatprep.mubr.msk.f32.mxu0 %vm264_vm0, %v237_v54  ;;  %v239_v0 = vld [vmem:[%s2803_s1 + $0x18] sm:$0xff] }
  0x5f   : > { %2036 = vmatprep.mubr.msk.f32.mxu1 %vm264_vm0, %v237_v54 }
  0x61   : > { %1997 = vmatmul.mubr.msk.f32.gmra.mrb[2].mxu0 %vm264_vm0, %v237_v54 }
  0x62   : > { %2037 = vmatmul.mubr.msk.f32.gmra.mrb[2].mxu1 %vm264_vm0, %v237_v54  ;;  %1998 = vmatprep.mubr.msk.f32.mxu0 %vm264_vm0, %v238_v55 }
  0x63   : > { %2038 = vmatprep.mubr.msk.f32.mxu1 %vm264_vm0, %v238_v55 }
  0x65   : > { %1999 = vmatmul.mubr.msk.f32.gmra.mrb[4].mxu0 %vm264_vm0, %v238_v55 }
  0x66   : > { %2039 = vmatmul.mubr.msk.f32.gmra.mrb[4].mxu1 %vm264_vm0, %v238_v55  ;;  %2000 = vmatprep.mubr.msk.f32.mxu0 %vm264_vm0, %v239_v0 }
  0x67   : > { %2040 = vmatprep.mubr.msk.f32.mxu1 %vm264_vm0, %v239_v0 }
  0x69   : > { %2001 = vmatmul.mubr.msk.f32.gmra.mrb[6].mxu0 %vm264_vm0, %v239_v0 }
  0x6a   : > { %2041 = vmatmul.mubr.msk.f32.gmra.mrb[6].mxu1 %vm264_vm0, %v239_v0  ;;  %802 = vmatprep.mubr.f32.mxu0 %v2311_v6 }
  0x6b   : > { %891 = vmatprep.mubr.f32.mxu1 %v2311_v6 }
  0x8f   : > { %v247_v56 = vpop.permute.xlu0 %246  ;;  %v257_v17 = vpop.permute.xlu1 %256 }
  0x93   : > { %v252_v3 = vpop.permute.xlu0 %251  ;;  %v262_v41 = vpop.permute.xlu1 %261 }
 0x130   : > { %v535_v57 = vpop.f32.mrb[0].mxu0 }
 0x131   : > { %v536_v58 = vadd.f32 %v535_v57, %v247_v56  ;;  %v624_v59 = vpop.f32.mrb[0].mxu1  ;;  %v537_v60 = vpop.f32.mrb[1].mxu0 }
 0x132   : > { %v625_v61 = vadd.f32 %v624_v59, %v247_v56  ;;  %v538_v62 = vadd.f32 %v537_v60, %v247_v56  ;;  %v626_v63 = vpop.f32.mrb[1].mxu1 }
 0x133   : > { %v663_v1 = vmul.f32 0.01, %v536_v58  ;;  %v627_v2 = vadd.f32 %v626_v63, %v247_v56  ;;  %vm647_vm2 = vcmp.gt.f32.partialorder %v536_v58, 0.0 }
 0x134   : > { %vm649_vm3 = vcmp.gt.f32.partialorder %v625_v61, 0.0  ;;  %v665_v4 = vmul.f32 0.01, %v625_v61  ;;  %v541_v5 = vpop.f32.mrb[2].mxu0  ;;  %vm648_vm4 = vcmp.gt.f32.partialorder %v538_v62, 0.0 }
 0x135   : > { %v630_v7 = vpop.f32.mrb[2].mxu1  ;;  %v664_v8 = vmul.f32 0.01, %v538_v62  ;;  %v542_v9 = vadd.f32 %v541_v5, %v252_v3  ;;  %v543_v11 = vpop.f32.mrb[3].mxu0  ;;  %v679_v13 = vsel %vm647_vm2, %v536_v58, %v663_v1  ;;  %v666_v14 = vmul.f32 0.01, %v627_v2 }
 0x136   : > { %v631_v10 = vadd.f32 %v630_v7, %v252_v3  ;;  %v632_v12 = vpop.f32.mrb[3].mxu1  ;;  %v544_v15 = vadd.f32 %v543_v11, %v252_v3  ;;  %vm650_vm7 = vcmp.gt.f32.partialorder %v627_v2, 0.0  ;;  %v681_v22 = vsel %vm649_vm3, %v625_v61, %v665_v4  ;;  %v1892_v7 = vld [vmem:[%s2803_s1 + $0x20] sm:$0xff]  ;;  %v708_v11 = vpop.permute.xlu0 %707 }
 0x137   : > { %v633_v16 = vadd.f32 %v632_v12, %v252_v3  ;;  %vm651_vm5 = vcmp.gt.f32.partialorder %v542_v9, 0.0  ;;  %v667_v18 = vmul.f32 0.01, %v542_v9  ;;  %v680_v38 = vsel %vm648_vm4, %v538_v62, %v664_v8  ;;  %v1893_v8 = vld [vmem:[%s2803_s1 + $0x28] sm:$0xff] }
 0x138   : > { %vm653_vm6 = vcmp.gt.f32.partialorder %v631_v10, 0.0  ;;  %v669_v19 = vmul.f32 0.01, %v631_v10  ;;  %vm652_vm8 = vcmp.gt.f32.partialorder %v544_v15, 0.0  ;;  %v668_v20 = vmul.f32 0.01, %v544_v15 }
 0x139   : > { %v670_v21 = vmul.f32 0.01, %v633_v16  ;;  %v683_v23 = vsel %vm651_vm5, %v542_v9, %v667_v18  ;;  %vm654_vm9 = vcmp.gt.f32.partialorder %v633_v16, 0.0  ;;  %v547_v25 = vpop.f32.mrb[4].mxu0  ;;  %v636_v26 = vpop.f32.mrb[4].mxu1  ;;  %v682_v39 = vsel %vm650_vm7, %v627_v2, %v666_v14  ;;  %v1894_v9 = vld [vmem:[%s2803_s1 + $0x30] sm:$0xff] }
 0x13a   : > { %v685_v24 = vsel %vm653_vm6, %v631_v10, %v669_v19  ;;  %v2140_v27 = vpack.c.bf16 %v683_v23, %v679_v13  ;;  %v548_v29 = vadd.f32 %v547_v25, %v257_v17  ;;  %v637_v30 = vadd.f32 %v636_v26, %v257_v17  ;;  %v549_v31 = vpop.f32.mrb[5].mxu0  ;;  %v638_v32 = vpop.f32.mrb[5].mxu1  ;;  %v1895_v10 = vld [vmem:[%s2803_s1 + $0x38] sm:$0xff] }
 0x13b   : > { %v2148_v28 = vpack.c.bf16 %v685_v24, %v681_v22  ;;  %v550_v33 = vadd.f32 %v549_v31, %v257_v17  ;;  %v639_v34 = vadd.f32 %v638_v32, %v257_v17  ;;  %v684_v36 = vsel %vm652_vm8, %v544_v15, %v668_v20 }
 0x13c   : > { %v553_v35 = vpop.f32.mrb[6].mxu0  ;;  %v671_v37 = vmul.f32 0.01, %v548_v29  ;;  %v686_v40 = vsel %vm654_vm9, %v633_v16, %v670_v21  ;;  %vm655_vm10 = vcmp.gt.f32.partialorder %v548_v29, 0.0  ;;  %vm657_vm11 = vcmp.gt.f32.partialorder %v637_v30, 0.0  ;;  %v713_v21 = vpop.permute.xlu1 %712 }
 0x13d   : > { %v673_v42 = vmul.f32 0.01, %v637_v30  ;;  %vm656_vm12 = vcmp.gt.f32.partialorder %v550_v33, 0.0  ;;  %v672_v43 = vmul.f32 0.01, %v550_v33  ;;  %vm658_vm13 = vcmp.gt.f32.partialorder %v639_v34, 0.0 }
 0x13e   : > { %v554_v44 = vadd.f32 %v553_v35, %v262_v41  ;;  %v642_v45 = vpop.f32.mrb[6].mxu1  ;;  %v555_v46 = vpop.f32.mrb[7].mxu0  ;;  %v2138_v47 = vpack.c.bf16 %v684_v36, %v680_v38  ;;  %v674_v48 = vmul.f32 0.01, %v639_v34  ;;  %v2146_v52 = vpack.c.bf16 %v686_v40, %v682_v39 }
 0x13f   : > { %v643_v49 = vadd.f32 %v642_v45, %v262_v41  ;;  %v556_v50 = vadd.f32 %v555_v46, %v262_v41  ;;  %v644_v51 = vpop.f32.mrb[7].mxu1  ;;  %v687_v53 = vsel %vm655_vm10, %v548_v29, %v671_v37  ;;  %v689_v57 = vsel %vm657_vm11, %v637_v30, %v673_v42  ;;  %v718_v36 = vpop.permute.xlu0 %717 }
 0x140   : > { %vm659_vm14 = vcmp.gt.f32.partialorder %v554_v44, 0.0  ;;  %v675_v54 = vmul.f32 0.01, %v554_v44  ;;  %v645_v55 = vadd.f32 %v644_v51, %v262_v41  ;;  %2139 = vmatprep.subr.bf16.mxu0 %v2138_v47  ;;  %2147 = vmatprep.subr.bf16.mxu1 %v2146_v52  ;;  %v688_v62 = vsel %vm656_vm12, %v550_v33, %v672_v43 }
 0x141   : > { %vm661_vm15 = vcmp.gt.f32.partialorder %v643_v49, 0.0  ;;  %v677_v0 = vmul.f32 0.01, %v643_v49  ;;  %vm660_vm0 = vcmp.gt.f32.partialorder %v556_v50, 0.0  ;;  %v676_v56 = vmul.f32 0.01, %v556_v50  ;;  %2141 = vmatpush1.bf16.msra.mxu0 %v2140_v27  ;;  %2149 = vmatpush1.bf16.msra.mxu1 %v2148_v28 }
 0x142   : > { %v691_v58 = vsel %vm659_vm14, %v554_v44, %v675_v54  ;;  %vm662_vm1 = vcmp.gt.f32.partialorder %v645_v55, 0.0  ;;  %v678_v59 = vmul.f32 0.01, %v645_v55  ;;  %v690_v3 = vsel %vm658_vm13, %v639_v34, %v674_v48 }
 0x143   : > { %v2144_v60 = vpack.c.bf16 %v691_v58, %v687_v53  ;;  %v693_v61 = vsel %vm661_vm15, %v643_v49, %v677_v0  ;;  %v692_v63 = vsel %vm660_vm0, %v556_v50, %v676_v56  ;;  %vm725_vm2 = vcmask 261120  }
 0x144   : > { %v2152_v1 = vpack.c.bf16 %v693_v61, %v689_v57  ;;  %v2142_v2 = vpack.c.bf16 %v692_v63, %v688_v62  ;;  %v694_v4 = vsel %vm662_vm1, %v645_v55, %v678_v59  ;;  %v723_v57 = vpop.permute.xlu1 %722 }
 0x145   : > { %v2150_v5 = vpack.c.bf16 %v694_v4, %v690_v3 }
 0x146   : > { %2143 = vmatprep.subr.bf16.mxu0 %v2142_v2 }
 0x147   : > { %2151 = vmatprep.subr.bf16.mxu1 %v2150_v5  ;;  %2145 = vmatpush1.bf16.msra.mxu0 %v2144_v60 }
 0x148   : > { %2153 = vmatpush1.bf16.msra.mxu1 %v2152_v1 }
 0x14a   : > { %1900 = vmatmul.mubr.msk.f32.vlgmr.msra.gmra.mrb[8].mxu0 %vm725_vm2, %v1892_v7 }
 0x14b   : > { %1904 = vmatmul.mubr.msk.f32.vlgmr.msra.gmra.mrb[8].mxu1 %vm725_vm2, %v1892_v7  ;;  %808 = vmatprep.mubr.f32.mxu0 %v2311_v6 }
 0x14c   : > { %897 = vmatprep.mubr.f32.mxu1 %v2311_v6 }
 0x14e   : > { %1901 = vmatmul.mubr.msk.f32.gmra.mrb[10].mxu0 %vm725_vm2, %v1893_v8 }
 0x14f   : > { %1905 = vmatmul.mubr.msk.f32.gmra.mrb[10].mxu1 %vm725_vm2, %v1893_v8  ;;  %814 = vmatprep.mubr.f32.mxu0 %v2311_v6 }
 0x150   : > { %903 = vmatprep.mubr.f32.mxu1 %v2311_v6 }
 0x152   : > { %1902 = vmatmul.mubr.msk.f32.gmra.mrb[12].mxu0 %vm725_vm2, %v1894_v9 }
 0x153   : > { %1906 = vmatmul.mubr.msk.f32.gmra.mrb[12].mxu1 %vm725_vm2, %v1894_v9  ;;  %820 = vmatprep.mubr.f32.mxu0 %v2311_v6 }
 0x154   : > { %909 = vmatprep.mubr.f32.mxu1 %v2311_v6 }
 0x156   : > { %1903 = vmatmul.mubr.msk.f32.gmra.mrb[14].mxu0 %vm725_vm2, %v1895_v10 }
 0x157   : > { %1907 = vmatmul.mubr.msk.f32.gmra.mrb[14].mxu1 %vm725_vm2, %v1895_v10  ;;  %1070 = vmatprep.mubr.f32.mxu0 %v2311_v6 }
 0x158   : > { %1159 = vmatprep.mubr.f32.mxu1 %v2311_v6 }
 0x21d   : > { %v804_v12 = vpop.f32.mrb[8].mxu0 }
 0x21e   : > { %v805_v13 = vadd.f32 %v804_v12, %v708_v11  ;;  %v893_v14 = vpop.f32.mrb[8].mxu1  ;;  %v806_v15 = vpop.f32.mrb[9].mxu0 }
 0x21f   : > { %v894_v16 = vadd.f32 %v893_v14, %v708_v11  ;;  %v807_v17 = vadd.f32 %v806_v15, %v708_v11  ;;  %v895_v18 = vpop.f32.mrb[9].mxu1 }
 0x220   : > { %v932_v19 = vmul.f32 0.01, %v805_v13  ;;  %v896_v20 = vadd.f32 %v895_v18, %v708_v11  ;;  %vm916_vm3 = vcmp.gt.f32.partialorder %v805_v13, 0.0 }
 0x221   : > { %vm918_vm4 = vcmp.gt.f32.partialorder %v894_v16, 0.0  ;;  %v934_v22 = vmul.f32 0.01, %v894_v16  ;;  %v810_v23 = vpop.f32.mrb[10].mxu0  ;;  %vm917_vm5 = vcmp.gt.f32.partialorder %v807_v17, 0.0 }
 0x222   : > { %v899_v24 = vpop.f32.mrb[10].mxu1  ;;  %v933_v25 = vmul.f32 0.01, %v807_v17  ;;  %v811_v26 = vadd.f32 %v810_v23, %v713_v21  ;;  %v812_v28 = vpop.f32.mrb[11].mxu0  ;;  %v948_v30 = vsel %vm916_vm3, %v805_v13, %v932_v19  ;;  %v935_v31 = vmul.f32 0.01, %v896_v20 }
 0x223   : > { %v900_v27 = vadd.f32 %v899_v24, %v713_v21  ;;  %v901_v29 = vpop.f32.mrb[11].mxu1  ;;  %v813_v32 = vadd.f32 %v812_v28, %v713_v21  ;;  %vm919_vm8 = vcmp.gt.f32.partialorder %v896_v20, 0.0  ;;  %v950_v39 = vsel %vm918_vm4, %v894_v16, %v934_v22  ;;  %v1908_v24 = vld [vmem:[%s2803_s1 + $0x40] sm:$0xff]  ;;  %v977_v28 = vpop.permute.xlu0 %976 }
 0x224   : > { %v902_v33 = vadd.f32 %v901_v29, %v713_v21  ;;  %vm920_vm6 = vcmp.gt.f32.partialorder %v811_v26, 0.0  ;;  %v936_v34 = vmul.f32 0.01, %v811_v26  ;;  %v949_v55 = vsel %vm917_vm5, %v807_v17, %v933_v25  ;;  %v1909_v25 = vld [vmem:[%s2803_s1 + $0x48] sm:$0xff] }
 0x225   : > { %vm922_vm7 = vcmp.gt.f32.partialorder %v900_v27, 0.0  ;;  %v938_v35 = vmul.f32 0.01, %v900_v27  ;;  %vm921_vm9 = vcmp.gt.f32.partialorder %v813_v32, 0.0  ;;  %v937_v37 = vmul.f32 0.01, %v813_v32 }
 0x226   : > { %v939_v38 = vmul.f32 0.01, %v902_v33  ;;  %v952_v40 = vsel %vm920_vm6, %v811_v26, %v936_v34  ;;  %vm923_vm10 = vcmp.gt.f32.partialorder %v902_v33, 0.0  ;;  %v816_v42 = vpop.f32.mrb[12].mxu0  ;;  %v905_v43 = vpop.f32.mrb[12].mxu1  ;;  %v951_v0 = vsel %vm919_vm8, %v896_v20, %v935_v31  ;;  %v1910_v26 = vld [vmem:[%s2803_s1 + $0x50] sm:$0xff] }
 0x227   : > { %v954_v41 = vsel %vm922_vm7, %v900_v27, %v938_v35  ;;  %v2156_v44 = vpack.c.bf16 %v952_v40, %v948_v30  ;;  %v817_v46 = vadd.f32 %v816_v42, %v718_v36  ;;  %v906_v47 = vadd.f32 %v905_v43, %v718_v36  ;;  %v818_v48 = vpop.f32.mrb[13].mxu0  ;;  %v907_v49 = vpop.f32.mrb[13].mxu1  ;;  %v1911_v27 = vld [vmem:[%s2803_s1 + $0x58] sm:$0xff] }
 0x228   : > { %v2164_v45 = vpack.c.bf16 %v954_v41, %v950_v39  ;;  %v819_v50 = vadd.f32 %v818_v48, %v718_v36  ;;  %v908_v51 = vadd.f32 %v907_v49, %v718_v36  ;;  %v953_v53 = vsel %vm921_vm9, %v813_v32, %v937_v37 }
 0x229   : > { %v822_v52 = vpop.f32.mrb[14].mxu0  ;;  %v940_v54 = vmul.f32 0.01, %v817_v46  ;;  %v955_v56 = vsel %vm923_vm10, %v902_v33, %v939_v38  ;;  %vm924_vm11 = vcmp.gt.f32.partialorder %v817_v46, 0.0  ;;  %vm926_vm12 = vcmp.gt.f32.partialorder %v906_v47, 0.0  ;;  %v982_v38 = vpop.permute.xlu1 %981 }
 0x22a   : > { %v942_v58 = vmul.f32 0.01, %v906_v47  ;;  %vm925_vm13 = vcmp.gt.f32.partialorder %v819_v50, 0.0  ;;  %v941_v59 = vmul.f32 0.01, %v819_v50  ;;  %vm927_vm14 = vcmp.gt.f32.partialorder %v908_v51, 0.0 }
 0x22b   : > { %v823_v60 = vadd.f32 %v822_v52, %v723_v57  ;;  %v911_v61 = vpop.f32.mrb[14].mxu1  ;;  %v824_v62 = vpop.f32.mrb[15].mxu0  ;;  %v2154_v63 = vpack.c.bf16 %v953_v53, %v949_v55  ;;  %v943_v1 = vmul.f32 0.01, %v908_v51  ;;  %v2162_v5 = vpack.c.bf16 %v955_v56, %v951_v0 }
 0x22c   : > { %v912_v2 = vadd.f32 %v911_v61, %v723_v57  ;;  %v825_v3 = vadd.f32 %v824_v62, %v723_v57  ;;  %v913_v4 = vpop.f32.mrb[15].mxu1  ;;  %v956_v7 = vsel %vm924_vm11, %v817_v46, %v940_v54  ;;  %v958_v12 = vsel %vm926_vm12, %v906_v47, %v942_v58  ;;  %v987_v53 = vpop.permute.xlu0 %986 }
 0x22d   : > { %vm928_vm15 = vcmp.gt.f32.partialorder %v823_v60, 0.0  ;;  %v944_v8 = vmul.f32 0.01, %v823_v60  ;;  %v914_v9 = vadd.f32 %v913_v4, %v723_v57  ;;  %2155 = vmatprep.subr.bf16.mxu0 %v2154_v63  ;;  %2163 = vmatprep.subr.bf16.mxu1 %v2162_v5  ;;  %v957_v17 = vsel %vm925_vm13, %v819_v50, %v941_v59 }
 0x22e   : > { %vm930_vm0 = vcmp.gt.f32.partialorder %v912_v2, 0.0  ;;  %v946_v10 = vmul.f32 0.01, %v912_v2  ;;  %vm929_vm1 = vcmp.gt.f32.partialorder %v825_v3, 0.0  ;;  %v945_v11 = vmul.f32 0.01, %v825_v3  ;;  %2157 = vmatpush1.bf16.msra.mxu0 %v2156_v44  ;;  %2165 = vmatpush1.bf16.msra.mxu1 %v2164_v45 }
 0x22f   : > { %v960_v13 = vsel %vm928_vm15, %v823_v60, %v944_v8  ;;  %vm931_vm3 = vcmp.gt.f32.partialorder %v914_v9, 0.0  ;;  %v947_v14 = vmul.f32 0.01, %v914_v9  ;;  %v959_v21 = vsel %vm927_vm14, %v908_v51, %v943_v1 }
 0x230   : > { %v2160_v15 = vpack.c.bf16 %v960_v13, %v956_v7  ;;  %v962_v16 = vsel %vm930_vm0, %v912_v2, %v946_v10  ;;  %v961_v18 = vsel %vm929_vm1, %v825_v3, %v945_v11 }
 0x231   : > { %v2168_v19 = vpack.c.bf16 %v962_v16, %v958_v12  ;;  %v2158_v20 = vpack.c.bf16 %v961_v18, %v957_v17  ;;  %v963_v22 = vsel %vm931_vm3, %v914_v9, %v947_v14  ;;  %v992_v12 = vpop.permute.xlu1 %991 }
 0x232   : > { %v2166_v23 = vpack.c.bf16 %v963_v22, %v959_v21 }
 0x233   : > { %2159 = vmatprep.subr.bf16.mxu0 %v2158_v20 }
 0x234   : > { %2167 = vmatprep.subr.bf16.mxu1 %v2166_v23  ;;  %2161 = vmatpush1.bf16.msra.mxu0 %v2160_v15 }
 0x235   : > { %2169 = vmatpush1.bf16.msra.mxu1 %v2168_v19 }
 0x237   : > { %1916 = vmatmul.mubr.msk.f32.vlgmr.msra.gmra.mrb[16].mxu0 %vm725_vm2, %v1908_v24 }
 0x238   : > { %1920 = vmatmul.mubr.msk.f32.vlgmr.msra.gmra.mrb[16].mxu1 %vm725_vm2, %v1908_v24  ;;  %1076 = vmatprep.mubr.f32.mxu0 %v2311_v6 }
 0x239   : > { %1165 = vmatprep.mubr.f32.mxu1 %v2311_v6 }
 0x23b   : > { %1917 = vmatmul.mubr.msk.f32.gmra.mrb[18].mxu0 %vm725_vm2, %v1909_v25 }
 0x23c   : > { %1921 = vmatmul.mubr.msk.f32.gmra.mrb[18].mxu1 %vm725_vm2, %v1909_v25  ;;  %1082 = vmatprep.mubr.f32.mxu0 %v2311_v6 }
 0x23d   : > { %1171 = vmatprep.mubr.f32.mxu1 %v2311_v6 }
 0x23f   : > { %1918 = vmatmul.mubr.msk.f32.gmra.mrb[20].mxu0 %vm725_vm2, %v1910_v26 }
 0x240   : > { %1922 = vmatmul.mubr.msk.f32.gmra.mrb[20].mxu1 %vm725_vm2, %v1910_v26  ;;  %1088 = vmatprep.mubr.f32.mxu0 %v2311_v6 }
 0x241   : > { %1177 = vmatprep.mubr.f32.mxu1 %v2311_v6 }
 0x243   : > { %1919 = vmatmul.mubr.msk.f32.gmra.mrb[22].mxu0 %vm725_vm2, %v1911_v27 }
 0x244   : > { %1923 = vmatmul.mubr.msk.f32.gmra.mrb[22].mxu1 %vm725_vm2, %v1911_v27  ;;  %1338 = vmatprep.mubr.f32.mxu0 %v2311_v6 }
 0x245   : > { %1427 = vmatprep.mubr.f32.mxu1 %v2311_v6 }
 0x30a   : > { %v1072_v29 = vpop.f32.mrb[16].mxu0 }
 0x30b   : > { %v1073_v30 = vadd.f32 %v1072_v29, %v977_v28  ;;  %v1161_v31 = vpop.f32.mrb[16].mxu1  ;;  %v1074_v32 = vpop.f32.mrb[17].mxu0 }
 0x30c   : > { %v1162_v33 = vadd.f32 %v1161_v31, %v977_v28  ;;  %v1075_v34 = vadd.f32 %v1074_v32, %v977_v28  ;;  %v1163_v35 = vpop.f32.mrb[17].mxu1 }
 0x30d   : > { %v1200_v36 = vmul.f32 0.01, %v1073_v30  ;;  %v1164_v37 = vadd.f32 %v1163_v35, %v977_v28  ;;  %vm1184_vm4 = vcmp.gt.f32.partialorder %v1073_v30, 0.0 }
 0x30e   : > { %vm1186_vm5 = vcmp.gt.f32.partialorder %v1162_v33, 0.0  ;;  %v1202_v39 = vmul.f32 0.01, %v1162_v33  ;;  %v1078_v40 = vpop.f32.mrb[18].mxu0  ;;  %vm1185_vm6 = vcmp.gt.f32.partialorder %v1075_v34, 0.0 }
 0x30f   : > { %v1167_v41 = vpop.f32.mrb[18].mxu1  ;;  %v1201_v42 = vmul.f32 0.01, %v1075_v34  ;;  %v1079_v43 = vadd.f32 %v1078_v40, %v982_v38  ;;  %v1080_v45 = vpop.f32.mrb[19].mxu0  ;;  %v1216_v47 = vsel %vm1184_vm4, %v1073_v30, %v1200_v36  ;;  %v1203_v48 = vmul.f32 0.01, %v1164_v37 }
 0x310   : > { %v1168_v44 = vadd.f32 %v1167_v41, %v982_v38  ;;  %v1169_v46 = vpop.f32.mrb[19].mxu1  ;;  %v1081_v49 = vadd.f32 %v1080_v45, %v982_v38  ;;  %vm1187_vm9 = vcmp.gt.f32.partialorder %v1164_v37, 0.0  ;;  %v1218_v0 = vsel %vm1186_vm5, %v1162_v33, %v1202_v39  ;;  %v1924_v41 = vld [vmem:[%s2803_s1 + $0x60] sm:$0xff]  ;;  %v1245_v45 = vpop.permute.xlu0 %1244 }
 0x311   : > { %v1170_v50 = vadd.f32 %v1169_v46, %v982_v38  ;;  %vm1188_vm7 = vcmp.gt.f32.partialorder %v1079_v43, 0.0  ;;  %v1204_v51 = vmul.f32 0.01, %v1079_v43  ;;  %v1217_v9 = vsel %vm1185_vm6, %v1075_v34, %v1201_v42  ;;  %v1925_v42 = vld [vmem:[%s2803_s1 + $0x68] sm:$0xff] }
 0x312   : > { %vm1190_vm8 = vcmp.gt.f32.partialorder %v1168_v44, 0.0  ;;  %v1206_v52 = vmul.f32 0.01, %v1168_v44  ;;  %vm1189_vm10 = vcmp.gt.f32.partialorder %v1081_v49, 0.0  ;;  %v1205_v54 = vmul.f32 0.01, %v1081_v49 }
 0x313   : > { %v1207_v55 = vmul.f32 0.01, %v1170_v50  ;;  %v1220_v56 = vsel %vm1188_vm7, %v1079_v43, %v1204_v51  ;;  %vm1191_vm11 = vcmp.gt.f32.partialorder %v1170_v50, 0.0  ;;  %v1084_v58 = vpop.f32.mrb[20].mxu0  ;;  %v1173_v59 = vpop.f32.mrb[20].mxu1  ;;  %v1219_v10 = vsel %vm1187_vm9, %v1164_v37, %v1203_v48  ;;  %v1926_v43 = vld [vmem:[%s2803_s1 + $0x70] sm:$0xff] }
 0x314   : > { %v1222_v57 = vsel %vm1190_vm8, %v1168_v44, %v1206_v52  ;;  %v2172_v60 = vpack.c.bf16 %v1220_v56, %v1216_v47  ;;  %v1085_v62 = vadd.f32 %v1084_v58, %v987_v53  ;;  %v1174_v63 = vadd.f32 %v1173_v59, %v987_v53  ;;  %v1086_v1 = vpop.f32.mrb[21].mxu0  ;;  %v1175_v2 = vpop.f32.mrb[21].mxu1  ;;  %v1927_v44 = vld [vmem:[%s2803_s1 + $0x78] sm:$0xff] }
 0x315   : > { %v2180_v61 = vpack.c.bf16 %v1222_v57, %v1218_v0  ;;  %v1087_v3 = vadd.f32 %v1086_v1, %v987_v53  ;;  %v1176_v4 = vadd.f32 %v1175_v2, %v987_v53  ;;  %v1221_v7 = vsel %vm1189_vm10, %v1081_v49, %v1205_v54 }
 0x316   : > { %v1090_v5 = vpop.f32.mrb[22].mxu0  ;;  %v1208_v8 = vmul.f32 0.01, %v1085_v62  ;;  %v1223_v11 = vsel %vm1191_vm11, %v1170_v50, %v1207_v55  ;;  %vm1192_vm12 = vcmp.gt.f32.partialorder %v1085_v62, 0.0  ;;  %vm1194_vm13 = vcmp.gt.f32.partialorder %v1174_v63, 0.0  ;;  %v1250_v55 = vpop.permute.xlu1 %1249 }
 0x317   : > { %v1210_v13 = vmul.f32 0.01, %v1174_v63  ;;  %vm1193_vm14 = vcmp.gt.f32.partialorder %v1087_v3, 0.0  ;;  %v1209_v14 = vmul.f32 0.01, %v1087_v3  ;;  %vm1195_vm15 = vcmp.gt.f32.partialorder %v1176_v4, 0.0 }
 0x318   : > { %v1091_v15 = vadd.f32 %v1090_v5, %v992_v12  ;;  %v1179_v16 = vpop.f32.mrb[22].mxu1  ;;  %v1092_v17 = vpop.f32.mrb[23].mxu0  ;;  %v2170_v18 = vpack.c.bf16 %v1221_v7, %v1217_v9  ;;  %v1211_v19 = vmul.f32 0.01, %v1176_v4  ;;  %v2178_v23 = vpack.c.bf16 %v1223_v11, %v1219_v10 }
 0x319   : > { %v1180_v20 = vadd.f32 %v1179_v16, %v992_v12  ;;  %v1093_v21 = vadd.f32 %v1092_v17, %v992_v12  ;;  %v1181_v22 = vpop.f32.mrb[23].mxu1  ;;  %v1224_v24 = vsel %vm1192_vm12, %v1085_v62, %v1208_v8  ;;  %v1226_v29 = vsel %vm1194_vm13, %v1174_v63, %v1210_v13  ;;  %v1255_v7 = vpop.permute.xlu0 %1254 }
 0x31a   : > { %vm1196_vm0 = vcmp.gt.f32.partialorder %v1091_v15, 0.0  ;;  %v1212_v25 = vmul.f32 0.01, %v1091_v15  ;;  %v1182_v26 = vadd.f32 %v1181_v22, %v992_v12  ;;  %2171 = vmatprep.subr.bf16.mxu0 %v2170_v18  ;;  %2179 = vmatprep.subr.bf16.mxu1 %v2178_v23  ;;  %v1225_v34 = vsel %vm1193_vm14, %v1087_v3, %v1209_v14 }
 0x31b   : > { %vm1198_vm1 = vcmp.gt.f32.partialorder %v1180_v20, 0.0  ;;  %v1214_v27 = vmul.f32 0.01, %v1180_v20  ;;  %vm1197_vm3 = vcmp.gt.f32.partialorder %v1093_v21, 0.0  ;;  %v1213_v28 = vmul.f32 0.01, %v1093_v21  ;;  %2173 = vmatpush1.bf16.msra.mxu0 %v2172_v60  ;;  %2181 = vmatpush1.bf16.msra.mxu1 %v2180_v61 }
 0x31c   : > { %v1228_v30 = vsel %vm1196_vm0, %v1091_v15, %v1212_v25  ;;  %vm1199_vm4 = vcmp.gt.f32.partialorder %v1182_v26, 0.0  ;;  %v1215_v31 = vmul.f32 0.01, %v1182_v26  ;;  %v1227_v38 = vsel %vm1195_vm15, %v1176_v4, %v1211_v19 }
 0x31d   : > { %v2176_v32 = vpack.c.bf16 %v1228_v30, %v1224_v24  ;;  %v1230_v33 = vsel %vm1198_vm1, %v1180_v20, %v1214_v27  ;;  %v1229_v35 = vsel %vm1197_vm3, %v1093_v21, %v1213_v28 }
 0x31e   : > { %v2184_v36 = vpack.c.bf16 %v1230_v33, %v1226_v29  ;;  %v2174_v37 = vpack.c.bf16 %v1229_v35, %v1225_v34  ;;  %v1231_v39 = vsel %vm1199_vm4, %v1182_v26, %v1215_v31  ;;  %v1260_v29 = vpop.permute.xlu1 %1259 }
 0x31f   : > { %v2182_v40 = vpack.c.bf16 %v1231_v39, %v1227_v38 }
 0x320   : > { %2175 = vmatprep.subr.bf16.mxu0 %v2174_v37 }
 0x321   : > { %2183 = vmatprep.subr.bf16.mxu1 %v2182_v40  ;;  %2177 = vmatpush1.bf16.msra.mxu0 %v2176_v32 }
 0x322   : > { %2185 = vmatpush1.bf16.msra.mxu1 %v2184_v36 }
 0x324   : > { %1932 = vmatmul.mubr.msk.f32.vlgmr.msra.gmra.mrb[24].mxu0 %vm725_vm2, %v1924_v41 }
 0x325   : > { %1936 = vmatmul.mubr.msk.f32.vlgmr.msra.gmra.mrb[24].mxu1 %vm725_vm2, %v1924_v41  ;;  %1344 = vmatprep.mubr.f32.mxu0 %v2311_v6 }
 0x326   : > { %1433 = vmatprep.mubr.f32.mxu1 %v2311_v6 }
 0x328   : > { %1933 = vmatmul.mubr.msk.f32.gmra.mrb[26].mxu0 %vm725_vm2, %v1925_v42 }
 0x329   : > { %1937 = vmatmul.mubr.msk.f32.gmra.mrb[26].mxu1 %vm725_vm2, %v1925_v42  ;;  %1350 = vmatprep.mubr.f32.mxu0 %v2311_v6 }
 0x32a   : > { %1439 = vmatprep.mubr.f32.mxu1 %v2311_v6 }
 0x32c   : > { %1934 = vmatmul.mubr.msk.f32.gmra.mrb[28].mxu0 %vm725_vm2, %v1926_v43 }
 0x32d   : > { %1938 = vmatmul.mubr.msk.f32.gmra.mrb[28].mxu1 %vm725_vm2, %v1926_v43  ;;  %1356 = vmatprep.mubr.f32.mxu0 %v2311_v6 }
 0x32e   : > { %1445 = vmatprep.mubr.f32.mxu1 %v2311_v6 }
 0x330   : > { %1935 = vmatmul.mubr.msk.f32.gmra.mrb[30].mxu0 %vm725_vm2, %v1927_v44 }
 0x331   : > { %1939 = vmatmul.mubr.msk.f32.gmra.mrb[30].mxu1 %vm725_vm2, %v1927_v44  ;;  %1603 = vmatprep.mubr.f32.mxu0 %v2311_v6 }
 0x332   : > { %1686 = vmatprep.mubr.f32.mxu1 %v2311_v6 }
 0x3f7   : > { %v1340_v46 = vpop.f32.mrb[24].mxu0 }
 0x3f8   : > { %v1341_v47 = vadd.f32 %v1340_v46, %v1245_v45  ;;  %v1429_v48 = vpop.f32.mrb[24].mxu1  ;;  %v1342_v49 = vpop.f32.mrb[25].mxu0 }
 0x3f9   : > { %v1430_v50 = vadd.f32 %v1429_v48, %v1245_v45  ;;  %v1343_v51 = vadd.f32 %v1342_v49, %v1245_v45  ;;  %v1431_v52 = vpop.f32.mrb[25].mxu1 }
 0x3fa   : > { %v1468_v53 = vmul.f32 0.01, %v1341_v47  ;;  %v1432_v54 = vadd.f32 %v1431_v52, %v1245_v45  ;;  %vm1452_vm5 = vcmp.gt.f32.partialorder %v1341_v47, 0.0 }
 0x3fb   : > { %vm1454_vm6 = vcmp.gt.f32.partialorder %v1430_v50, 0.0  ;;  %v1470_v0 = vmul.f32 0.01, %v1430_v50  ;;  %v1346_v56 = vpop.f32.mrb[26].mxu0  ;;  %vm1453_vm7 = vcmp.gt.f32.partialorder %v1343_v51, 0.0 }
 0x3fc   : > { %v1435_v57 = vpop.f32.mrb[26].mxu1  ;;  %v1469_v58 = vmul.f32 0.01, %v1343_v51  ;;  %v1347_v59 = vadd.f32 %v1346_v56, %v1250_v55  ;;  %v1348_v61 = vpop.f32.mrb[27].mxu0  ;;  %v1484_v63 = vsel %vm1452_vm5, %v1341_v47, %v1468_v53  ;;  %v1471_v1 = vmul.f32 0.01, %v1432_v54 }
 0x3fd   : > { %v1436_v60 = vadd.f32 %v1435_v57, %v1250_v55  ;;  %v1437_v62 = vpop.f32.mrb[27].mxu1  ;;  %v1349_v2 = vadd.f32 %v1348_v61, %v1250_v55  ;;  %vm1455_vm10 = vcmp.gt.f32.partialorder %v1432_v54, 0.0  ;;  %v1486_v10 = vsel %vm1454_vm6, %v1430_v50, %v1470_v0  ;;  %v1940_v57 = vld [vmem:[%s2803_s1 + $0x80] sm:$0xff] }
 0x3fe   : > { %v1438_v3 = vadd.f32 %v1437_v62, %v1250_v55  ;;  %vm1456_vm8 = vcmp.gt.f32.partialorder %v1347_v59, 0.0  ;;  %v1472_v4 = vmul.f32 0.01, %v1347_v59  ;;  %v1485_v26 = vsel %vm1453_vm7, %v1343_v51, %v1469_v58  ;;  %v1941_v58 = vld [vmem:[%s2803_s1 + $0x88] sm:$0xff] }
 0x3ff   : > { %vm1458_vm9 = vcmp.gt.f32.partialorder %v1436_v60, 0.0  ;;  %v1474_v5 = vmul.f32 0.01, %v1436_v60  ;;  %vm1457_vm11 = vcmp.gt.f32.partialorder %v1349_v2, 0.0  ;;  %v1473_v8 = vmul.f32 0.01, %v1349_v2 }
 0x400   : > { %v1475_v9 = vmul.f32 0.01, %v1438_v3  ;;  %v1488_v11 = vsel %vm1456_vm8, %v1347_v59, %v1472_v4  ;;  %vm1459_vm12 = vcmp.gt.f32.partialorder %v1438_v3, 0.0  ;;  %v1352_v13 = vpop.f32.mrb[28].mxu0  ;;  %v1441_v14 = vpop.f32.mrb[28].mxu1  ;;  %v1487_v27 = vsel %vm1455_vm10, %v1432_v54, %v1471_v1  ;;  %v1942_v59 = vld [vmem:[%s2803_s1 + $0x90] sm:$0xff] }
 0x401   : > { %v1490_v12 = vsel %vm1458_vm9, %v1436_v60, %v1474_v5  ;;  %v2188_v15 = vpack.c.bf16 %v1488_v11, %v1484_v63  ;;  %v1353_v17 = vadd.f32 %v1352_v13, %v1255_v7  ;;  %v1442_v18 = vadd.f32 %v1441_v14, %v1255_v7  ;;  %v1354_v19 = vpop.f32.mrb[29].mxu0  ;;  %v1443_v20 = vpop.f32.mrb[29].mxu1  ;;  %v1943_v60 = vld [vmem:[%s2803_s1 + $0x98] sm:$0xff] }
 0x402   : > { %v2196_v16 = vpack.c.bf16 %v1490_v12, %v1486_v10  ;;  %v1355_v21 = vadd.f32 %v1354_v19, %v1255_v7  ;;  %v1444_v22 = vadd.f32 %v1443_v20, %v1255_v7  ;;  %v1489_v24 = vsel %vm1457_vm11, %v1349_v2, %v1473_v8 }
 0x403   : > { %v1358_v23 = vpop.f32.mrb[30].mxu0  ;;  %v1476_v25 = vmul.f32 0.01, %v1353_v17  ;;  %v1491_v28 = vsel %vm1459_vm12, %v1438_v3, %v1475_v9  ;;  %vm1460_vm13 = vcmp.gt.f32.partialorder %v1353_v17, 0.0  ;;  %vm1462_vm14 = vcmp.gt.f32.partialorder %v1442_v18, 0.0  ;;  %v1513_v3 = vpop.permute.xlu0 %1512 }
 0x404   : > { %v1478_v30 = vmul.f32 0.01, %v1442_v18  ;;  %vm1461_vm15 = vcmp.gt.f32.partialorder %v1355_v21, 0.0  ;;  %v1477_v31 = vmul.f32 0.01, %v1355_v21  ;;  %vm1463_vm0 = vcmp.gt.f32.partialorder %v1444_v22, 0.0 }
 0x405   : > { %v1359_v32 = vadd.f32 %v1358_v23, %v1260_v29  ;;  %v1447_v33 = vpop.f32.mrb[30].mxu1  ;;  %v1360_v34 = vpop.f32.mrb[31].mxu0  ;;  %v2186_v35 = vpack.c.bf16 %v1489_v24, %v1485_v26  ;;  %v1479_v36 = vmul.f32 0.01, %v1444_v22  ;;  %v2194_v40 = vpack.c.bf16 %v1491_v28, %v1487_v27 }
 0x406   : > { %v1448_v37 = vadd.f32 %v1447_v33, %v1260_v29  ;;  %v1361_v38 = vadd.f32 %v1360_v34, %v1260_v29  ;;  %v1449_v39 = vpop.f32.mrb[31].mxu1  ;;  %v1492_v41 = vsel %vm1460_vm13, %v1353_v17, %v1476_v25  ;;  %v1494_v46 = vsel %vm1462_vm14, %v1442_v18, %v1478_v30 }
 0x407   : > { %vm1464_vm1 = vcmp.gt.f32.partialorder %v1359_v32, 0.0  ;;  %v1480_v42 = vmul.f32 0.01, %v1359_v32  ;;  %v1450_v43 = vadd.f32 %v1449_v39, %v1260_v29  ;;  %2187 = vmatprep.subr.bf16.mxu0 %v2186_v35  ;;  %2195 = vmatprep.subr.bf16.mxu1 %v2194_v40  ;;  %v1493_v51 = vsel %vm1461_vm15, %v1355_v21, %v1477_v31 }
 0x408   : > { %vm1466_vm3 = vcmp.gt.f32.partialorder %v1448_v37, 0.0  ;;  %v1482_v44 = vmul.f32 0.01, %v1448_v37  ;;  %vm1465_vm4 = vcmp.gt.f32.partialorder %v1361_v38, 0.0  ;;  %v1481_v45 = vmul.f32 0.01, %v1361_v38  ;;  %2189 = vmatpush1.bf16.msra.mxu0 %v2188_v15  ;;  %2197 = vmatpush1.bf16.msra.mxu1 %v2196_v16 }
 0x409   : > { %v1496_v47 = vsel %vm1464_vm1, %v1359_v32, %v1480_v42  ;;  %vm1467_vm5 = vcmp.gt.f32.partialorder %v1450_v43, 0.0  ;;  %v1483_v48 = vmul.f32 0.01, %v1450_v43  ;;  %v1495_v55 = vsel %vm1463_vm0, %v1444_v22, %v1479_v36 }
 0x40a   : > { %v2192_v49 = vpack.c.bf16 %v1496_v47, %v1492_v41  ;;  %v1498_v50 = vsel %vm1466_vm3, %v1448_v37, %v1482_v44  ;;  %v1497_v52 = vsel %vm1465_vm4, %v1361_v38, %v1481_v45  ;;  %v2312_v61 = vmov 1966171168  }
 0x40b   : > { %v2200_v53 = vpack.c.bf16 %v1498_v50, %v1494_v46  ;;  %v2190_v54 = vpack.c.bf16 %v1497_v52, %v1493_v51  ;;  %v1499_v0 = vsel %vm1467_vm5, %v1450_v43, %v1483_v48  ;;  %v1712_v62 = vunpack.c.l.s4 %v2312_v61 }
 0x40c   : > { %v2198_v56 = vpack.c.bf16 %v1499_v0, %v1495_v55  ;;  %v1714_v63 = vlaneseq }
 0x40d   : > { %2191 = vmatprep.subr.bf16.mxu0 %v2190_v54  ;;  %v1713_v1 = vunpack.c.0.s8 %v1712_v62 }
 0x40e   : > { %2199 = vmatprep.subr.bf16.mxu1 %v2198_v56  ;;  %2193 = vmatpush1.bf16.msra.mxu0 %v2192_v49  ;;  %v1715_v2 = vshrl.u32 %v1714_v63, 7 }
 0x40f   : > { %2201 = vmatpush1.bf16.msra.mxu1 %v2200_v53 }
 0x410   : > { %v1716_v11 = vsub.s32 %v1713_v1, %v1715_v2 }
 0x411   : > { %1948 = vmatmul.mubr.msk.f32.vlgmr.msra.gmra.mrb[32].mxu0 %vm725_vm2, %v1940_v57 }
 0x412   : > { %1952 = vmatmul.mubr.msk.f32.vlgmr.msra.gmra.mrb[32].mxu1 %vm725_vm2, %v1940_v57  ;;  %1609 = vmatprep.mubr.f32.mxu0 %v2311_v6 }
 0x413   : > { %1692 = vmatprep.mubr.f32.mxu1 %v2311_v6 }
 0x415   : > { %1949 = vmatmul.mubr.msk.f32.gmra.mrb[34].mxu0 %vm725_vm2, %v1941_v58 }
 0x416   : > { %1953 = vmatmul.mubr.msk.f32.gmra.mrb[34].mxu1 %vm725_vm2, %v1941_v58  ;;  %1613 = vmatprep.mubr.f32.mxu0 %v2311_v6 }
 0x417   : > { %1696 = vmatprep.mubr.f32.mxu1 %v2311_v6 }
 0x419   : > { %1950 = vmatmul.mubr.msk.f32.gmra.mrb[36].mxu0 %vm725_vm2, %v1942_v59 }
 0x41a   : > { %1954 = vmatmul.mubr.msk.f32.gmra.mrb[36].mxu1 %vm725_vm2, %v1942_v59  ;;  %1617 = vmatprep.mubr.f32.mxu0 %v2311_v6 }
 0x41b   : > { %1700 = vmatprep.mubr.f32.mxu1 %v2311_v6 }
 0x41d   : > { %1951 = vmatmul.mubr.msk.f32.gmra.mrb[38].mxu0 %vm725_vm2, %v1943_v60 }
 0x41e   : > { %1955 = vmatmul.mubr.msk.f32.gmra.mrb[38].mxu1 %vm725_vm2, %v1943_v60  ;;  %vm1736_vm2 = vcmp.lt.s32.totalorder %v1714_v63, 512 }
 0x4e4   : > { %v1605_v4 = vpop.f32.mrb[32].mxu0 }
 0x4e5   : > { %v1606_v5 = vadd.f32 %v1605_v4, %v1513_v3  ;;  %v1688_v7 = vpop.f32.mrb[32].mxu1  ;;  %v1607_v8 = vpop.f32.mrb[33].mxu0 }
 0x4e6   : > { %v1689_v9 = vadd.f32 %v1688_v7, %v1513_v3  ;;  %v1608_v10 = vadd.f32 %v1607_v8, %v1513_v3  ;;  %v1690_v6 = vpop.f32.mrb[33].mxu1 }
 0x4e7   : > { %v1691_v12 = vadd.f32 %v1690_v6, %v1513_v3 }
 0x4e8   : > { %v1709_v13 = vcombine.low %v1606_v5, %v1608_v10  ;;  %v1611_v14 = vpop.f32.mrb[34].mxu0 }
 0x4e9   : > { %v1710_v15 = vcombine.low %v1689_v9, %v1691_v12  ;;  %v1694_v16 = vpop.f32.mrb[34].mxu1  ;;  %v1612_v17 = vpop.f32.mrb[35].mxu0 }
 0x4ea   : > { %v1717_v18 = vrot.slane %v1709_v13, %v1716_v11  ;;  %v1695_v19 = vpop.f32.mrb[35].mxu1 }
 0x4eb   : > { %v1724_v20 = vrot.slane %v1710_v15, %v1716_v11 }
 0x4ec   : > { %v1615_v21 = vpop.f32.mrb[36].mxu0 }
 0x4ed   : > { %v1725_v22 = vcombine.low %v1717_v18, %v1724_v20  ;;  %v1698_v23 = vpop.f32.mrb[36].mxu1  ;;  %v1616_v24 = vpop.f32.mrb[37].mxu0 }
 0x4ee   : > { %v1699_v25 = vpop.f32.mrb[37].mxu1 }
 0x4ef   : > { %v1732_v26 = vrot.slane %v1725_v22, %v1716_v11 }
 0x4f0   : > { %v1619_v27 = vpop.f32.mrb[38].mxu0 }
 0x4f1   : > { %v1702_v28 = vpop.f32.mrb[38].mxu1  ;;  %v1620_v29 = vpop.f32.mrb[39].mxu0  ;;  %1738 = vst.msk [vmem:[%s164_s7] sm:$0xf] %vm1736_vm2, %v1732_v26 }
 0x4f2   : > { %v1703_v30 = vpop.f32.mrb[39].mxu1 }
 0x4f3   : > { %2259 = shalt.err (!%p2256_p3)
}
 0x4f4   : > { %s2260_s26 = scalar_lea.hbm %s2758_s11, 64  ;;  %s2264_s29 = scalar_lea.hbm %s2805_s3, 256 }
 0x4f5   : > { %p2261_p4 = scmp.ne.s32.totalorder %s2758_s11, %s2260_s26  ;;  %p2265_p9 = scmp.lt.u32.totalorder %s2758_s11, %s2805_s3 }
 0x4f6   : > { %p2266_p10 = scmp.lt.u32.totalorder %s2264_s29, %s2260_s26  ;;  %p2268_p12 = scmp.lt.u32.totalorder %s2260_s26, %s2758_s11 }
 0x4f7   : > { %p2262_p7 = pnand %p2261_p4, %p2369_p5 }
 0x4f8   : > { %p2267_p11 = por %p2266_p10, %p2265_p9 }
 0x4f9   : > { %p2263_p8 = pneg %p2262_p7 }
 0x4fa   : > { %p2269_p13 = por %p2268_p12, %p2267_p11 }
 0x4fc   : > { %p2270_p0 = pnand %p2269_p13, %p2263_p8 }
 0x4fe   : > { %2273 = shalt.err (!%p2270_p0)
}
 0x4ff   : > { %2202 = dma.vmem_to_hbm [thread:$0]  (%p2369_p5), %s2760_s8, 64, %s2758_s11, %s1740_s17  }
 0x500 PF: > { %p2208_p1 = scmp.ge.s32.totalorder %s2308_s15, 2  ;;  %s1766_s5 = sand.u32 1, %s2296_s12  }
 0x501   : > { %s1767_s16 = scalar_lea.sflag [#allocation3], %s1766_s5 }
 0x502   : > { %p2205_p2 = pnand %p2208_p1, %p2373_p6 }
 0x504   : > { %2291 = dma.done.wait (!%p2205_p2), %s1767_s16, 64  }
 0x505   : > { %2293 = vsyncadd (!%p2205_p2), %s1767_s16, 4294967232  ;;  %p13_p3 = scmp.ge.s32.totalorder %s2357_s18, 6   ;;  %s2810_s12 = smov %s2300_s13 }
 0x506   : > { %s2811_s13 = smov %s2304_s14  ;;  %s2812_s14 = smov %s2367_s21 }
 0x507   : > { %s2813_s15 = smov %s2357_s18  ;;  %15 = sbr.rel (!%p13_p3) target bundleno = 3 (0x3), region = 75 }
 0x50e   :  { %1772 = vsyncpa [#allocation3], 1 }
 0x50f   :  { %1774 = vsyncpa [#allocation3 + $0x1], 1 }

</bundles_post_ra>
